<compile_context>
chip_gen: v5e
topology: v5e:2x2
jax: 0.10.0
libtpu: 0.0.40
codegen_flags: <defaults>
</compile_context>

<pallas_src>
import functools

import jax
import jax.numpy as jnp
from jax.experimental import pallas as pl
from jax.experimental.pallas import tpu as pltpu

LN_EPS = 1e-5  # torch.nn.LayerNorm default


def _round_up(n, m):
    return ((n + m - 1) // m) * m


def _vmem_capacity_bytes():
    """Physical VMEM per TensorCore; conservative fallback if the query fails."""
    try:
        info = pltpu.get_tpu_info()
        cap = getattr(info, "vmem_capacity_bytes", None)
        if cap:
            return int(cap)
    except Exception:
        pass
    return 64 * 2**20  # v7x-sized fallback (smallest of v5e/v6e/v7x)


def _pick_row_tile(N, row_tile):
    """Row tile: 128-aligned when N >= 128 (MXU rows), else 8-aligned.
    Prefer a tile that divides N exactly so no padded activation copy is needed."""
    base = 128 if N >= 128 else 8
    cap = max(base, min(row_tile, _round_up(N, base)))
    cap -= cap % base
    for tm in range(cap, base - 1, -base):
        if N % tm == 0:
            return tm, N                     # no padding needed
    return cap, _round_up(N, cap)            # fallback: pad token axis


def _pick_h_tile(H, E, w_itemsize, vmem_cap, max_h_tile=2048):
    """H chunk for streaming W1/W2: multiple of 128 dividing H, sized so the
    double-buffered (E,TH)+(TH,E) chunks use at most ~1/4 of VMEM."""
    if H % 128 != 0 or H <= 128:
        return H
    budget = vmem_cap // 4
    by_budget = max(128, budget // max(1, 4 * E * w_itemsize))
    target = min(H, max_h_tile, by_budget)
    target -= target % 128
    for th in range(target, 127, -128):
        if H % th == 0:
            return th
    return H


def _transformer_block_kernel(
    x_ref,               # (TM, E)  f32 row tile of tokens
    g1_ref, b1_ref,      # (1, E)   f32   LayerNorm 1
    wvo_ref, bo_ref,     # (E, E) cd, (1, E) f32   fused attention proj (Wv@Wo), bias
    g2_ref, b2_ref,      # (1, E)   f32   LayerNorm 2
    w1_ref, bb1_ref,     # (E, TH) cd, (1, TH) f32   FFN in  (H chunk)
    w2_ref, bb2_ref,     # (TH, E) cd, (1, E)  f32   FFN out (H chunk)
    o_ref,               # (TM, E)
    acc_ref,             # (TM, E) f32 scratch: residual + FFN accumulator
    x1n_ref,             # (TM, E) cd  scratch: LN2 output (FFN matmul LHS)
    *, compute_dtype,
):
    hk = pl.program_id(1)

    # ---- once per row tile (hk == 0): LN1, fused attention, residual 1, LN2 ----
    @pl.when(hk == 0)
    def _():
        x = x_ref[...].astype(jnp.float32)
        mu = jnp.mean(x, axis=-1, keepdims=True)
        var = jnp.mean((x - mu) ** 2, axis=-1, keepdims=True)
        xn = (x - mu) * jax.lax.rsqrt(var + LN_EPS)
        xn = xn * g1_ref[0] + b1_ref[0]

        # heads == 1: softmax over a size-1 axis == 1  =>  attn out == V, and the
        # Wv / Wo projections collapse into one matmul against W_vo = Wv @ Wo.
        proj = jnp.dot(xn.astype(compute_dtype), wvo_ref[...],
                       preferred_element_type=jnp.float32) + bo_ref[0]
        x1 = x + proj                                   # residual 1
        acc_ref[...] = x1                               # basis for residual 2

        mu2 = jnp.mean(x1, axis=-1, keepdims=True)
        var2 = jnp.mean((x1 - mu2) ** 2, axis=-1, keepdims=True)
        x1n = (x1 - mu2) * jax.lax.rsqrt(var2 + LN_EPS)
        x1n_ref[...] = (x1n * g2_ref[0] + b2_ref[0]).astype(compute_dtype)

    # ---- every hk: one H chunk of the FFN, accumulated into acc_ref (f32) ----
    h = jnp.dot(x1n_ref[...], w1_ref[...],
                preferred_element_type=jnp.float32) + bb1_ref[0]     # (TM, TH) f32
    h = jnp.maximum(h, 0.0).astype(compute_dtype)                    # shrink live bytes
    acc_ref[...] += jnp.dot(h, w2_ref[...],
                            preferred_element_type=jnp.float32)

    # ---- last hk: add the output bias once and store the lane-dense tile ----
    @pl.when(hk == pl.num_programs(1) - 1)
    def _():
        o_ref[...] = (acc_ref[...] + bb2_ref[0]).astype(o_ref.dtype)


def prepare_params(raw, compute_dtype=jnp.bfloat16):
    """One-time weight prep: fuse Wv@Wo (exact, f32) and cast matmul weights to the
    compute dtype so no per-call casts run outside the kernel."""
    wvo = raw["wv"].astype(jnp.float32) @ raw["wo"].astype(jnp.float32)
    return {
        "g1": raw["g1"], "b1": raw["b1"],
        "wvo": wvo.astype(compute_dtype), "bo": raw["bo"],
        "g2": raw["g2"], "b2": raw["b2"],
        "w1": raw["w1"].astype(compute_dtype), "bb1": raw["bb1"],
        "w2": raw["w2"].astype(compute_dtype), "bb2": raw["bb2"],
    }


def transformer_block(x, params, *, row_tile=None, max_h_tile=2048):
    """x: (B, S, E) float32.  params: output of prepare_params()."""
    B, S, E = x.shape
    H = params["w1"].shape[1]                       # 4 * E
    N = B * S
    compute_dtype = params["w1"].dtype
    w_itemsize = jnp.dtype(compute_dtype).itemsize

    vmem_cap = _vmem_capacity_bytes()
    if row_tile is None:
        row_tile = 512 if vmem_cap >= 96 * 2**20 else 256   # v5e/v6e vs v7x

    tm, n_pad = _pick_row_tile(N, row_tile)
    th = _pick_h_tile(H, E, w_itemsize, vmem_cap, max_h_tile)
    n_h = H // th

    # Every op in the block is per-token: flatten to a (B*S, E) token matrix.
    xf = x.reshape(N, E)
    if n_pad != N:
        xf = jnp.pad(xf, ((0, n_pad - N), (0, 0)))   # zero rows are harmless (discarded)
    grid = (n_pad // tm, n_h)                        # reduction (H) axis last / innermost

    in_specs = [
        pl.BlockSpec((tm, E), lambda i, hk: (i, 0)),   # x row tile (streamed over i)
        pl.BlockSpec((1, E), lambda i, hk: (0, 0)),    # ln1 gamma
        pl.BlockSpec((1, E), lambda i, hk: (0, 0)),    # ln1 beta
        pl.BlockSpec((E, E), lambda i, hk: (0, 0)),    # W_vo (resident)
        pl.BlockSpec((1, E), lambda i, hk: (0, 0)),    # bo
        pl.BlockSpec((1, E), lambda i, hk: (0, 0)),    # ln2 gamma
        pl.BlockSpec((1, E), lambda i, hk: (0, 0)),    # ln2 beta
        pl.BlockSpec((E, th), lambda i, hk: (0, hk)),  # W1 H-chunk (streamed over hk)
        pl.BlockSpec((1, th), lambda i, hk: (0, hk)),  # b1 H-chunk
        pl.BlockSpec((th, E), lambda i, hk: (hk, 0)),  # W2 H-chunk (streamed over hk)
        pl.BlockSpec((1, E), lambda i, hk: (0, 0)),    # b2
    ]
    out_specs = pl.BlockSpec((tm, E), lambda i, hk: (i, 0))   # resident across hk

    # Cost estimate (fused attn matmul + 2 FFN matmuls).
    flops = 2 * N * E * E + 4 * N * E * H
    weight_bytes = (E * E + 2 * E * H) * w_itemsize + (5 * E + H) * 4
    act_bytes = 2 * N * E * x.dtype.itemsize
    cost = pl.CostEstimate(flops=int(flops), transcendentals=int(2 * N),
                           bytes_accessed=int(weight_bytes + act_bytes))

    # Scoped-VMEM budget, derived from what is actually resident / streamed,
    # capped at 85% of physical VMEM (≈54 MiB v7x, ≈109 MiB v5e/v6e).
    resident_w = 2 * E * E * w_itemsize                 # W_vo, double-buffered
    stream_w = 4 * E * th * w_itemsize                  # W1+W2 chunks, double-buffered
    small = 2 * (6 * E + 2 * th) * 4                    # LN params + biases
    xio = 2 * 2 * tm * E * 4                            # x / o tiles, double-buffered
    scratch = tm * E * (4 + w_itemsize)                 # acc + x1n scratch
    interm = 2 * tm * max(E, th) * 4                    # live f32 intermediates
    est = resident_w + stream_w + small + xio + scratch + interm
    vmem_limit = int(min(int(vmem_cap * 0.85),
                         max(32 * 2**20, int(1.25 * est))))

    cparams = pltpu.CompilerParams(
        dimension_semantics=("parallel", "arbitrary"),  # rows across cores, H serial
        vmem_limit_bytes=vmem_limit,
    )

    out = pl.pallas_call(
        functools.partial(_transformer_block_kernel, compute_dtype=compute_dtype),
        grid_spec=pltpu.PrefetchScalarGridSpec(
            num_scalar_prefetch=0,
            grid=grid,
            in_specs=in_specs,
            out_specs=out_specs,
            scratch_shapes=[
                pltpu.VMEM((tm, E), jnp.float32),      # acc (residual + FFN sum)
                pltpu.VMEM((tm, E), compute_dtype),    # x1n (FFN matmul LHS)
            ],
        ),
        out_shape=jax.ShapeDtypeStruct((n_pad, E), x.dtype),
        compiler_params=cparams,
        cost_estimate=cost,
    )(
        xf,
        params["g1"], params["b1"],
        params["wvo"], params["bo"],
        params["g2"], params["b2"],
        params["w1"], params["bb1"],
        params["w2"], params["bb2"],
    )

    return out[:N].reshape(B, S, E)


def init_params(key, embed_size, heads):
    """Deterministic init mirroring the PyTorch module's parameter shapes.
    Linear weights are stored already transposed to (in, out) so math is x @ W."""
    assert embed_size % heads == 0
    head_dim = embed_size // heads
    # The reference PyTorch code applies Linear(head_dim, head_dim) to a tensor whose
    # last dim is embed_size, which only type-checks when heads == 1.
    assert heads == 1, "reference PyTorch module only executes with heads == 1"
    hidden = 4 * embed_size

    ks = jax.random.split(key, 12)

    def linear_w(k, fan_in, fan_out):
        bound = 1.0 / (fan_in ** 0.5)
        return jax.random.uniform(k, (fan_in, fan_out), jnp.float32, -bound, bound)

    def linear_b(k, fan_in, fan_out):
        bound = 1.0 / (fan_in ** 0.5)
        return jax.random.uniform(k, (1, fan_out), jnp.float32, -bound, bound)

    return {
        # LayerNorm 1 / 2 (torch default: ones / zeros)
        "g1": jnp.ones((1, embed_size), jnp.float32),
        "b1": jnp.zeros((1, embed_size), jnp.float32),
        "g2": jnp.ones((1, embed_size), jnp.float32),
        "b2": jnp.zeros((1, embed_size), jnp.float32),
        # attention (queries/keys/values: Linear(head_dim, head_dim, bias=False)).
        # wq/wk exist as module parameters but are mathematically dead in the forward
        # (softmax over a size-1 axis == 1), so the kernel never consumes them.
        "wq": linear_w(ks[0], head_dim, head_dim),
        "wk": linear_w(ks[1], head_dim, head_dim),
        "wv": linear_w(ks[2], head_dim, head_dim),
        "wo": linear_w(ks[3], embed_size, embed_size),
        "bo": linear_b(ks[4], embed_size, embed_size),
        # feed-forward
        "w1": linear_w(ks[5], embed_size, hidden),
        "bb1": linear_b(ks[6], embed_size, hidden),
        "w2": linear_w(ks[7], hidden, embed_size),
        "bb2": linear_b(ks[8], hidden, embed_size),
    }


def _layernorm(v, g, b):
    mu = jnp.mean(v, axis=-1, keepdims=True)
    var = jnp.mean((v - mu) ** 2, axis=-1, keepdims=True)
    return (v - mu) * jax.lax.rsqrt(var + LN_EPS) * g + b


def reference_jax_f32(x, p):
    """Pure-JAX literal replica of the PyTorch forward (heads == 1), full f32."""
    E = x.shape[-1]
    xn = _layernorm(x, p["g1"][0], p["b1"][0])
    q = xn @ p["wq"]
    k = xn @ p["wk"]
    v = xn @ p["wv"]
    energy = jnp.sum(q * k, axis=-1, keepdims=True) / (E ** 0.5)
    attn = jax.nn.softmax(energy[..., None], axis=-1)[..., 0]   # size-1 axis -> 1
    out = attn * v
    x1 = x + (out @ p["wo"] + p["bo"][0])
    x1n = _layernorm(x1, p["g2"][0], p["b2"][0])
    h = jnp.maximum(x1n @ p["w1"] + p["bb1"][0], 0.0)
    return x1 + (h @ p["w2"] + p["bb2"][0])


def reference_jax_compute(x, p):
    """Reference matching the kernel's numerics: fused W_vo, bf16 matmul operands,
    f32 accumulation, ReLU output stored in bf16."""
    cd = p["w1"].dtype
    f32 = jnp.float32
    xn = _layernorm(x, p["g1"][0], p["b1"][0])
    x1 = x + (jnp.dot(xn.astype(cd), p["wvo"], preferred_element_type=f32) + p["bo"][0])
    x1n = _layernorm(x1, p["g2"][0], p["b2"][0])
    h = jnp.maximum(jnp.dot(x1n.astype(cd), p["w1"],
                            preferred_element_type=f32) + p["bb1"][0], 0.0).astype(cd)
    y = jnp.dot(h, p["w2"], preferred_element_type=f32)
    return x1 + y + p["bb2"][0]


if __name__ == "__main__":
    B, S, E, heads = 2, 8, 32, 1
    key = jax.random.PRNGKey(0)
    kx, kp = jax.random.split(key)
    x = jax.random.normal(kx, (B, S, E), jnp.float32)
    raw = init_params(kp, E, heads)
    params = prepare_params(raw)          # fuse Wv@Wo + one-time bf16 cast

    out = transformer_block(x, params)
    out = jax.block_until_ready(out)
    assert out.shape == (B, S, E)

    # Tight check against a reference with identical fused/bf16 numerics.
    ref_cd = reference_jax_compute(x, params)
    assert jnp.allclose(out, ref_cd, atol=2e-3, rtol=2e-3), "mismatch vs. bf16 reference"

    # Loose check against the literal f32 PyTorch-equivalent forward.
    ref_f32 = reference_jax_f32(x, raw)
    assert jnp.allclose(out, ref_f32, atol=1e-1, rtol=1e-1), "mismatch vs. f32 reference"

    print("KERNEL_OK")
</pallas_src>

<mosaic_0001>
module attributes {stable_mosaic.version = 11 : i64} {
  func.func @_transformer_block_kernel(%arg0: i32, %arg1: i32, %arg2: memref<16x32xf32, #tpu.memory_space<vmem>>, %arg3: memref<1x32xf32, #tpu.memory_space<vmem>>, %arg4: memref<1x32xf32, #tpu.memory_space<vmem>>, %arg5: memref<32x32xbf16, #tpu.memory_space<vmem>>, %arg6: memref<1x32xf32, #tpu.memory_space<vmem>>, %arg7: memref<1x32xf32, #tpu.memory_space<vmem>>, %arg8: memref<1x32xf32, #tpu.memory_space<vmem>>, %arg9: memref<32x128xbf16, #tpu.memory_space<vmem>>, %arg10: memref<1x128xf32, #tpu.memory_space<vmem>>, %arg11: memref<128x32xbf16, #tpu.memory_space<vmem>>, %arg12: memref<1x32xf32, #tpu.memory_space<vmem>>, %arg13: memref<16x32xf32, #tpu.memory_space<vmem>>, %arg14: memref<16x32xf32, #tpu.memory_space<vmem>>, %arg15: memref<16x32xbf16, #tpu.memory_space<vmem>>) attributes {dimension_semantics = [#tpu.dimension_semantics<parallel>, #tpu.dimension_semantics<arbitrary>], iteration_bounds = array<i64: 1, 1>, scalar_prefetch = 0 : i64, scratch_operands = 2 : i64, tpu.core_type = #tpu.core_type<tc>, window_params = [{transform_indices = @transform_0, window_bounds = array<i64: 16, 32>}, {pipeline_mode = #tpu.pipeline_mode<synchronous>, transform_indices = @transform_1, window_bounds = array<i64: 1, 32>}, {pipeline_mode = #tpu.pipeline_mode<synchronous>, transform_indices = @transform_2, window_bounds = array<i64: 1, 32>}, {pipeline_mode = #tpu.pipeline_mode<synchronous>, transform_indices = @transform_3, window_bounds = array<i64: 32, 32>}, {pipeline_mode = #tpu.pipeline_mode<synchronous>, transform_indices = @transform_4, window_bounds = array<i64: 1, 32>}, {pipeline_mode = #tpu.pipeline_mode<synchronous>, transform_indices = @transform_5, window_bounds = array<i64: 1, 32>}, {pipeline_mode = #tpu.pipeline_mode<synchronous>, transform_indices = @transform_6, window_bounds = array<i64: 1, 32>}, {transform_indices = @transform_7, window_bounds = array<i64: 32, 128>}, {transform_indices = @transform_8, window_bounds = array<i64: 1, 128>}, {transform_indices = @transform_9, window_bounds = array<i64: 128, 32>}, {pipeline_mode = #tpu.pipeline_mode<synchronous>, transform_indices = @transform_10, window_bounds = array<i64: 1, 32>}, {transform_indices = @transform_11, window_bounds = array<i64: 16, 32>}]} {
    %c0_i32 = arith.constant 0 : i32
    %0 = arith.cmpi eq, %arg1, %c0_i32 : i32
    %1 = arith.extui %0 : i1 to i32
    %c0_i32_0 = arith.constant 0 : i32
    %2 = arith.cmpi ne, %1, %c0_i32_0 : i32
    scf.if %2 {
      %c0_16 = arith.constant 0 : index
      %c0_17 = arith.constant 0 : index
      %22 = vector.load %arg2[%c0_16, %c0_17] : memref<16x32xf32, #tpu.memory_space<vmem>>, vector<16x32xf32>
      %cst_18 = arith.constant dense<0.000000e+00> : vector<16xf32>
      %23 = vector.multi_reduction <add>, %22, %cst_18 [1] : vector<16x32xf32> to vector<16xf32>
      %24 = vector.shape_cast %23 : vector<16xf32> to vector<16x1xf32>
      %cst_19 = arith.constant 3.200000e+01 : f32
      %25 = vector.broadcast %cst_19 : f32 to vector<16x1xf32>
      %26 = arith.divf %24, %25 : vector<16x1xf32>
      %27 = vector.broadcast %26 : vector<16x1xf32> to vector<16x32xf32>
      %28 = arith.subf %22, %27 : vector<16x32xf32>
      %29 = arith.mulf %28, %28 : vector<16x32xf32>
      %cst_20 = arith.constant dense<0.000000e+00> : vector<16xf32>
      %30 = vector.multi_reduction <add>, %29, %cst_20 [1] : vector<16x32xf32> to vector<16xf32>
      %31 = vector.shape_cast %30 : vector<16xf32> to vector<16x1xf32>
      %cst_21 = arith.constant 3.200000e+01 : f32
      %32 = vector.broadcast %cst_21 : f32 to vector<16x1xf32>
      %33 = arith.divf %31, %32 : vector<16x1xf32>
      %34 = vector.broadcast %26 : vector<16x1xf32> to vector<16x32xf32>
      %35 = arith.subf %22, %34 : vector<16x32xf32>
      %cst_22 = arith.constant 9.99999974E-6 : f32
      %36 = vector.broadcast %cst_22 : f32 to vector<16x1xf32>
      %37 = arith.addf %33, %36 : vector<16x1xf32>
      %38 = math.rsqrt %37 : vector<16x1xf32>
      %39 = vector.broadcast %38 : vector<16x1xf32> to vector<16x32xf32>
      %40 = arith.mulf %35, %39 : vector<16x32xf32>
      %c0_23 = arith.constant 0 : index
      %c0_24 = arith.constant 0 : index
      %41 = vector.load %arg3[%c0_23, %c0_24] : memref<1x32xf32, #tpu.memory_space<vmem>>, vector<1x32xf32>
      %42 = vector.shape_cast %41 : vector<1x32xf32> to vector<32xf32>
      %43 = vector.shape_cast %42 : vector<32xf32> to vector<1x32xf32>
      %44 = vector.broadcast %43 : vector<1x32xf32> to vector<16x32xf32>
      %45 = arith.mulf %40, %44 : vector<16x32xf32>
      %c0_25 = arith.constant 0 : index
      %c0_26 = arith.constant 0 : index
      %46 = vector.load %arg4[%c0_25, %c0_26] : memref<1x32xf32, #tpu.memory_space<vmem>>, vector<1x32xf32>
      %47 = vector.shape_cast %46 : vector<1x32xf32> to vector<32xf32>
      %48 = vector.shape_cast %47 : vector<32xf32> to vector<1x32xf32>
      %49 = vector.broadcast %48 : vector<1x32xf32> to vector<16x32xf32>
      %50 = arith.addf %45, %49 : vector<16x32xf32>
      %51 = arith.truncf %50 : vector<16x32xf32> to vector<16x32xbf16>
      %c0_27 = arith.constant 0 : index
      %c0_28 = arith.constant 0 : index
      %52 = vector.load %arg5[%c0_27, %c0_28] : memref<32x32xbf16, #tpu.memory_space<vmem>>, vector<32x32xbf16>
      %cst_29 = arith.constant dense<0.000000e+00> : vector<16x32xf32>
      %53 = tpu.matmul %51, %52, %cst_29 {dimension_numbers = #tpu.dot_dimension_numbers<[1], [0], [0], [1], [0, 0, 1, 1], [], []>} : vector<16x32xbf16>, vector<32x32xbf16>, vector<16x32xf32> -> vector<16x32xf32>
      %c0_30 = arith.constant 0 : index
      %c0_31 = arith.constant 0 : index
      %54 = vector.load %arg6[%c0_30, %c0_31] : memref<1x32xf32, #tpu.memory_space<vmem>>, vector<1x32xf32>
      %55 = vector.shape_cast %54 : vector<1x32xf32> to vector<32xf32>
      %56 = vector.shape_cast %55 : vector<32xf32> to vector<1x32xf32>
      %57 = vector.broadcast %56 : vector<1x32xf32> to vector<16x32xf32>
      %58 = arith.addf %53, %57 : vector<16x32xf32>
      %59 = arith.addf %22, %58 : vector<16x32xf32>
      %c0_32 = arith.constant 0 : index
      %c0_33 = arith.constant 0 : index
      %60 = vector.load %arg14[%c0_32, %c0_33] : memref<16x32xf32, #tpu.memory_space<vmem>>, vector<16x32xf32>
      tpu.vector_store %arg14[%c0_32, %c0_33], %59 {strides = array<i32>} : memref<16x32xf32, #tpu.memory_space<vmem>>, vector<16x32xf32>,
      %cst_34 = arith.constant dense<0.000000e+00> : vector<16xf32>
      %61 = vector.multi_reduction <add>, %59, %cst_34 [1] : vector<16x32xf32> to vector<16xf32>
      %62 = vector.shape_cast %61 : vector<16xf32> to vector<16x1xf32>
      %cst_35 = arith.constant 3.200000e+01 : f32
      %63 = vector.broadcast %cst_35 : f32 to vector<16x1xf32>
      %64 = arith.divf %62, %63 : vector<16x1xf32>
      %65 = vector.broadcast %64 : vector<16x1xf32> to vector<16x32xf32>
      %66 = arith.subf %59, %65 : vector<16x32xf32>
      %67 = arith.mulf %66, %66 : vector<16x32xf32>
      %cst_36 = arith.constant dense<0.000000e+00> : vector<16xf32>
      %68 = vector.multi_reduction <add>, %67, %cst_36 [1] : vector<16x32xf32> to vector<16xf32>
      %69 = vector.shape_cast %68 : vector<16xf32> to vector<16x1xf32>
      %cst_37 = arith.constant 3.200000e+01 : f32
      %70 = vector.broadcast %cst_37 : f32 to vector<16x1xf32>
      %71 = arith.divf %69, %70 : vector<16x1xf32>
      %72 = vector.broadcast %64 : vector<16x1xf32> to vector<16x32xf32>
      %73 = arith.subf %59, %72 : vector<16x32xf32>
      %cst_38 = arith.constant 9.99999974E-6 : f32
      %74 = vector.broadcast %cst_38 : f32 to vector<16x1xf32>
      %75 = arith.addf %71, %74 : vector<16x1xf32>
      %76 = math.rsqrt %75 : vector<16x1xf32>
      %77 = vector.broadcast %76 : vector<16x1xf32> to vector<16x32xf32>
      %78 = arith.mulf %73, %77 : vector<16x32xf32>
      %c0_39 = arith.constant 0 : index
      %c0_40 = arith.constant 0 : index
      %79 = vector.load %arg7[%c0_39, %c0_40] : memref<1x32xf32, #tpu.memory_space<vmem>>, vector<1x32xf32>
      %80 = vector.shape_cast %79 : vector<1x32xf32> to vector<32xf32>
      %81 = vector.shape_cast %80 : vector<32xf32> to vector<1x32xf32>
      %82 = vector.broadcast %81 : vector<1x32xf32> to vector<16x32xf32>
      %83 = arith.mulf %78, %82 : vector<16x32xf32>
      %c0_41 = arith.constant 0 : index
      %c0_42 = arith.constant 0 : index
      %84 = vector.load %arg8[%c0_41, %c0_42] : memref<1x32xf32, #tpu.memory_space<vmem>>, vector<1x32xf32>
      %85 = vector.shape_cast %84 : vector<1x32xf32> to vector<32xf32>
      %86 = vector.shape_cast %85 : vector<32xf32> to vector<1x32xf32>
      %87 = vector.broadcast %86 : vector<1x32xf32> to vector<16x32xf32>
      %88 = arith.addf %83, %87 : vector<16x32xf32>
      %89 = arith.truncf %88 : vector<16x32xf32> to vector<16x32xbf16>
      %c0_43 = arith.constant 0 : index
      %c0_44 = arith.constant 0 : index
      %90 = vector.load %arg15[%c0_43, %c0_44] : memref<16x32xbf16, #tpu.memory_space<vmem>>, vector<16x32xbf16>
      tpu.vector_store %arg15[%c0_43, %c0_44], %89 {strides = array<i32>} : memref<16x32xbf16, #tpu.memory_space<vmem>>, vector<16x32xbf16>,
    } else {
    }
    %c0 = arith.constant 0 : index
    %c0_1 = arith.constant 0 : index
    %3 = vector.load %arg15[%c0, %c0_1] : memref<16x32xbf16, #tpu.memory_space<vmem>>, vector<16x32xbf16>
    %c0_2 = arith.constant 0 : index
    %c0_3 = arith.constant 0 : index
    %4 = vector.load %arg9[%c0_2, %c0_3] : memref<32x128xbf16, #tpu.memory_space<vmem>>, vector<32x128xbf16>
    %cst = arith.constant dense<0.000000e+00> : vector<16x128xf32>
    %5 = tpu.matmul %3, %4, %cst {dimension_numbers = #tpu.dot_dimension_numbers<[1], [0], [0], [1], [0, 0, 1, 1], [], []>} : vector<16x32xbf16>, vector<32x128xbf16>, vector<16x128xf32> -> vector<16x128xf32>
    %c0_4 = arith.constant 0 : index
    %c0_5 = arith.constant 0 : index
    %6 = vector.load %arg10[%c0_4, %c0_5] : memref<1x128xf32, #tpu.memory_space<vmem>>, vector<1x128xf32>
    %7 = vector.shape_cast %6 : vector<1x128xf32> to vector<128xf32>
    %8 = vector.shape_cast %7 : vector<128xf32> to vector<1x128xf32>
    %9 = vector.broadcast %8 : vector<1x128xf32> to vector<16x128xf32>
    %10 = arith.addf %5, %9 : vector<16x128xf32>
    %cst_6 = arith.constant 0.000000e+00 : f32
    %11 = vector.broadcast %cst_6 : f32 to vector<16x128xf32>
    %12 = arith.maximumf %10, %11 : vector<16x128xf32>
    %13 = arith.truncf %12 : vector<16x128xf32> to vector<16x128xbf16>
    %c0_7 = arith.constant 0 : index
    %c0_8 = arith.constant 0 : index
    %14 = vector.load %arg14[%c0_7, %c0_8] : memref<16x32xf32, #tpu.memory_space<vmem>>, vector<16x32xf32>
    %c0_9 = arith.constant 0 : index
    %c0_10 = arith.constant 0 : index
    %15 = vector.load %arg11[%c0_9, %c0_10] : memref<128x32xbf16, #tpu.memory_space<vmem>>, vector<128x32xbf16>
    %cst_11 = arith.constant dense<0.000000e+00> : vector<16x32xf32>
    %16 = tpu.matmul %13, %15, %cst_11 {dimension_numbers = #tpu.dot_dimension_numbers<[1], [0], [0], [1], [0, 0, 1, 1], [], []>} : vector<16x128xbf16>, vector<128x32xbf16>, vector<16x32xf32> -> vector<16x32xf32>
    %17 = arith.addf %14, %16 : vector<16x32xf32>
    %c0_12 = arith.constant 0 : index
    %c0_13 = arith.constant 0 : index
    %18 = vector.load %arg14[%c0_12, %c0_13] : memref<16x32xf32, #tpu.memory_space<vmem>>, vector<16x32xf32>
    tpu.vector_store %arg14[%c0_12, %c0_13], %17 {strides = array<i32>} : memref<16x32xf32, #tpu.memory_space<vmem>>, vector<16x32xf32>,
    %c0_i32_14 = arith.constant 0 : i32
    %19 = arith.cmpi eq, %arg1, %c0_i32_14 : i32
    %20 = arith.extui %19 : i1 to i32
    %c0_i32_15 = arith.constant 0 : i32
    %21 = arith.cmpi ne, %20, %c0_i32_15 : i32
    scf.if %21 {
      %c0_16 = arith.constant 0 : index
      %c0_17 = arith.constant 0 : index
      %22 = vector.load %arg14[%c0_16, %c0_17] : memref<16x32xf32, #tpu.memory_space<vmem>>, vector<16x32xf32>
      %c0_18 = arith.constant 0 : index
      %c0_19 = arith.constant 0 : index
      %23 = vector.load %arg12[%c0_18, %c0_19] : memref<1x32xf32, #tpu.memory_space<vmem>>, vector<1x32xf32>
      %24 = vector.shape_cast %23 : vector<1x32xf32> to vector<32xf32>
      %25 = vector.shape_cast %24 : vector<32xf32> to vector<1x32xf32>
      %26 = vector.broadcast %25 : vector<1x32xf32> to vector<16x32xf32>
      %27 = arith.addf %22, %26 : vector<16x32xf32>
      %c0_20 = arith.constant 0 : index
      %c0_21 = arith.constant 0 : index
      %28 = vector.load %arg13[%c0_20, %c0_21] : memref<16x32xf32, #tpu.memory_space<vmem>>, vector<16x32xf32>
      tpu.vector_store %arg13[%c0_20, %c0_21], %27 {strides = array<i32>} : memref<16x32xf32, #tpu.memory_space<vmem>>, vector<16x32xf32>,
    } else {
    }
    return
  }
  func.func @transform_0(%arg0: i32, %arg1: i32) -> (i32, i32) {
    %c0_i32 = arith.constant 0 : i32
    %c0_i32_0 = arith.constant 0 : i32
    return %arg0, %c0_i32 : i32, i32
  }
  func.func @transform_1(%arg0: i32, %arg1: i32) -> (i32, i32) {
    %c0_i32 = arith.constant 0 : i32
    %c0_i32_0 = arith.constant 0 : i32
    %c0_i32_1 = arith.constant 0 : i32
    return %c0_i32, %c0_i32_0 : i32, i32
  }
  func.func @transform_2(%arg0: i32, %arg1: i32) -> (i32, i32) {
    %c0_i32 = arith.constant 0 : i32
    %c0_i32_0 = arith.constant 0 : i32
    %c0_i32_1 = arith.constant 0 : i32
    return %c0_i32, %c0_i32_0 : i32, i32
  }
  func.func @transform_3(%arg0: i32, %arg1: i32) -> (i32, i32) {
    %c0_i32 = arith.constant 0 : i32
    %c0_i32_0 = arith.constant 0 : i32
    %c0_i32_1 = arith.constant 0 : i32
    return %c0_i32, %c0_i32_0 : i32, i32
  }
  func.func @transform_4(%arg0: i32, %arg1: i32) -> (i32, i32) {
    %c0_i32 = arith.constant 0 : i32
    %c0_i32_0 = arith.constant 0 : i32
    %c0_i32_1 = arith.constant 0 : i32
    return %c0_i32, %c0_i32_0 : i32, i32
  }
  func.func @transform_5(%arg0: i32, %arg1: i32) -> (i32, i32) {
    %c0_i32 = arith.constant 0 : i32
    %c0_i32_0 = arith.constant 0 : i32
    %c0_i32_1 = arith.constant 0 : i32
    return %c0_i32, %c0_i32_0 : i32, i32
  }
  func.func @transform_6(%arg0: i32, %arg1: i32) -> (i32, i32) {
    %c0_i32 = arith.constant 0 : i32
    %c0_i32_0 = arith.constant 0 : i32
    %c0_i32_1 = arith.constant 0 : i32
    return %c0_i32, %c0_i32_0 : i32, i32
  }
  func.func @transform_7(%arg0: i32, %arg1: i32) -> (i32, i32) {
    %c0_i32 = arith.constant 0 : i32
    %c0_i32_0 = arith.constant 0 : i32
    return %c0_i32, %arg1 : i32, i32
  }
  func.func @transform_8(%arg0: i32, %arg1: i32) -> (i32, i32) {
    %c0_i32 = arith.constant 0 : i32
    %c0_i32_0 = arith.constant 0 : i32
    return %c0_i32, %arg1 : i32, i32
  }
  func.func @transform_9(%arg0: i32, %arg1: i32) -> (i32, i32) {
    %c0_i32 = arith.constant 0 : i32
    %c0_i32_0 = arith.constant 0 : i32
    return %arg1, %c0_i32 : i32, i32
  }
  func.func @transform_10(%arg0: i32, %arg1: i32) -> (i32, i32) {
    %c0_i32 = arith.constant 0 : i32
    %c0_i32_0 = arith.constant 0 : i32
    %c0_i32_1 = arith.constant 0 : i32
    return %c0_i32, %c0_i32_0 : i32, i32
  }
  func.func @transform_11(%arg0: i32, %arg1: i32) -> (i32, i32) {
    %c0_i32 = arith.constant 0 : i32
    %c0_i32_0 = arith.constant 0 : i32
    return %arg0, %c0_i32 : i32, i32
  }
}

</mosaic_0001>

<bundles_post_ra>
// kernel: tpu_custom_call.1
= control target key start
LH: loop header
LB: loop body
LE: loop exit
PB: predicated region body
PF: predicated region fallthrough
CT: control target
= control target key end

     0   :  { %vm46_vm0 = vcmask 261120   ;;  %s656_s0 = inlined_call_operand.vmem [shape: f32[16,32], index: 0, kind: input, shape index: {}]   ;;  %s657_s1 = inlined_call_operand.vmem [shape: f32[1,32], index: 1, kind: input, shape index: {}]   ;;  %s658_s2 = inlined_call_operand.vmem [shape: f32[1,32], index: 2, kind: input, shape index: {}]   ;;  %s659_s3 = inlined_call_operand.vmem [shape: bf16[32,32], index: 3, kind: input, shape index: {}]   ;;  %s660_s4 = inlined_call_operand.vmem [shape: f32[1,32], index: 4, kind: input, shape index: {}]   ;;  %s661_s5 = inlined_call_operand.vmem [shape: f32[1,32], index: 5, kind: input, shape index: {}]   ;;  %s662_s6 = inlined_call_operand.vmem [shape: f32[1,32], index: 6, kind: input, shape index: {}]   ;;  %s663_s7 = inlined_call_operand.vmem [shape: bf16[32,128], index: 7, kind: input, shape index: {}]   ;;  %s664_s8 = inlined_call_operand.vmem [shape: f32[1,128], index: 8, kind: input, shape index: {}]   ;;  %s665_s9 = inlined_call_operand.vmem [shape: bf16[128,32], index: 9, kind: input, shape index: {}]   ;;  %s666_s10 = inlined_call_operand.vmem [shape: f32[1,32], index: 10, kind: input, shape index: {}]   ;;  %s667_s11 = inlined_call_operand.hbm [shape: f32[16,32], index: 11, kind: output, shape index: {}]  }
   0x1   :  { %v557_v0 = vld [vmem:[%s656_s0] sm:$0xff] }
   0x2   :  { %v47_v1 = vsel %vm46_vm0, %v557_v0, 0.0 }
   0x3   :  { %48 = vadd.xlane.f32.xlu0 %v47_v1 }
   0x4   :  { %16 = vsyncpa [#allocation5], 0  ;;  %v564_v2 = vld [vmem:[%s656_s0 + $0x8] sm:$0xff]  ;;  %v490_v4 = vmov 32.0   ;;  %v430_v23 = vld [vmem:[%s659_s3] sm:$0xff]  ;;  %vm210_vm12 = vcmask 257024  }
   0x5   :  { %v50_v3 = vsel %vm46_vm0, %v564_v2, 0.0  ;;  %454 = vrcp.f32 %v490_v4  ;;  %v431_v21 = vld [vmem:[%s659_s3 + $0x8] sm:$0xff]  ;;  %v447_v42 = vld [vmem:[%s657_s1] ss:$0 sm:$0xff]  ;;  %s364_s29 = sshll.u32 %s667_s11, 4  ;;  %s493_s30 = smov 8   ;;  %s365_s29 = int_to_ptr.hbm [resolvable:$true] %s364_s29 }
   0x6   :  { %140 = vmatpush.bf16.msra.mxu0 %v431_v21  ;;  %v448_v47 = vld [vmem:[%s658_s2] ss:$0 sm:$0xff] }
   0x7   :  { %v449_v52 = vld [vmem:[%s660_s4] ss:$0 sm:$0xff] }
   0xa   :  { %141 = vmatpush.bf16.msra.mxu0 %v430_v23 }
   0xb   :  { %51 = vadd.xlane.f32.xlu0 %v50_v3  ;;  %v455_v5 = vpop.eup %454 }
   0xc   :  { %v54_v6 = vmul.f32 32.0, %v455_v5  ;;  %vm58_vm1 = vweird.f32 %v455_v5 }
   0xe   :  { %v55_v7 = vsub.f32 1.0, %v54_v6 }
  0x10   :  { %v56_v8 = vmul.f32 %v455_v5, %v55_v7 }
  0x12   :  { %v57_v9 = vadd.f32 %v455_v5, %v56_v8 }
  0x14   :  { %v568_v10 = vsel %vm58_vm1, %v455_v5, %v57_v9 }
  0x76   :  { %v49_v11 = vpop.xlane.xlu0 %48 }
  0x77   :  { %v60_v12 = vmul.f32 %v568_v10, %v49_v11  ;;  %v434_v11 = vld [vmem:[%s663_s7 + $0x8] sm:$0xff] }
  0x78   :  { %250 = vmatpush.bf16.msra.mxu1 %v434_v11 }
  0x79   :  { %v62_v13 = vsub.f32 %v557_v0, %v60_v12 }
  0x7b   :  { %v64_v14 = vmul.f32 %v62_v13, %v62_v13 }
  0x7d   :  { %v66_v15 = vsel %vm46_vm0, %v64_v14, 0.0  ;;  %v433_v14 = vld [vmem:[%s663_s7] sm:$0xff] }
  0x7e   :  { %67 = vadd.xlane.f32.xlu1 %v66_v15  ;;  %v52_v16 = vpop.xlane.xlu0 %51  ;;  %251 = vmatpush.bf16.msra.mxu1 %v433_v14 }
  0x7f   :  { %v61_v17 = vmul.f32 %v568_v10, %v52_v16 }
  0x81   :  { %v63_v18 = vsub.f32 %v564_v2, %v61_v17 }
  0x83   :  { %v65_v19 = vmul.f32 %v63_v18, %v63_v18 }
  0x85   :  { %v69_v20 = vsel %vm46_vm0, %v65_v19, 0.0 }
  0x86   :  { %70 = vadd.xlane.f32.xlu1 %v69_v20  ;;  %v442_v20 = vld [vmem:[%s665_s9 + $0x38] sm:$0xff] }
  0x87   :  { %327 = vmatpush.bf16.msra.mxu2 %v442_v20 }
  0xf1   :  { %v68_v22 = vpop.xlane.xlu1 %67 }
  0xf2   :  { %v72_v24 = vmul.f32 %v68_v22, %v568_v10 }
  0xf4   :  { %v74_v25 = vadd.f32 1e-05, %v72_v24 }
  0xf6   :  { %456 = vrsqrt.f32 %v74_v25  ;;  %vm82_vm3 = vweird.f32 %v74_v25 }
  0xf9   :  { %v71_v26 = vpop.xlane.xlu1 %70 }
  0xfa   :  { %v73_v27 = vmul.f32 %v71_v26, %v568_v10 }
  0xfc   :  { %v457_v28 = vpop.eup %456  ;;  %v75_v29 = vadd.f32 1e-05, %v73_v27 }
  0xfd   :  { %v77_v30 = vmul.f32 %v457_v28, %v74_v25  ;;  %vm83_vm2 = vweird.f32 %v457_v28  ;;  %v450_v25 = vld [vmem:[%s661_s5] ss:$0 sm:$0xff] }
  0xfe   :  { %458 = vrsqrt.f32 %v75_v29  ;;  %vm84_vm4 = vmor %vm82_vm3, %vm83_vm2  ;;  %vm92_vm6 = vweird.f32 %v75_v29 }
  0xff   :  { %v78_v31 = vmul.f32 %v457_v28, %v77_v30 }
 0x101   :  { %v79_v32 = vmul.f32 0.5, %v78_v31 }
 0x103   :  { %v80_v33 = vsub.f32 1.5, %v79_v32 }
 0x104   :  { %v459_v34 = vpop.eup %458 }
 0x105   :  { %v81_v35 = vmul.f32 %v457_v28, %v80_v33  ;;  %v87_v36 = vmul.f32 %v459_v34, %v75_v29  ;;  %vm93_vm5 = vweird.f32 %v459_v34  ;;  %v451_v29 = vld [vmem:[%s662_s6] ss:$0 sm:$0xff] }
 0x106   :  { %vm94_vm7 = vmor %vm92_vm6, %vm93_vm5 }
 0x107   :  { %v88_v37 = vmul.f32 %v459_v34, %v87_v36  ;;  %v85_v38 = vsel %vm84_vm4, %v457_v28, %v81_v35  ;;  %v440_v28 = vld [vmem:[%s665_s9 + $0x28] sm:$0xff] }
 0x108   :  { %v96_v41 = vmul.f32 %v85_v38, %v62_v13 }
 0x109   :  { %v89_v39 = vmul.f32 0.5, %v88_v37 }
 0x10a   :  { %v102_v46 = vmul.f32 %v447_v42, %v96_v41 }
 0x10b   :  { %v90_v40 = vsub.f32 1.5, %v89_v39 }
 0x10c   :  { %v108_v49 = vadd.f32 %v448_v47, %v102_v46  ;;  %v436_v46 = vld [vmem:[%s665_s9 + $0x8] sm:$0xff] }
 0x10d   :  { %v91_v43 = vmul.f32 %v459_v34, %v90_v40 }
 0x10f   :  { %v95_v44 = vsel %vm94_vm7, %v459_v34, %v91_v43  ;;  %v439_v34 = vld [vmem:[%s665_s9 + $0x20] sm:$0xff] }
 0x110   :  { %v97_v45 = vmul.f32 %v95_v44, %v63_v18  ;;  %v438_v44 = vld [vmem:[%s665_s9 + $0x18] sm:$0xff] }
 0x112   :  { %v103_v48 = vmul.f32 %v447_v42, %v97_v45  ;;  %v437_v45 = vld [vmem:[%s665_s9 + $0x10] sm:$0xff] }
 0x114   :  { %v109_v50 = vadd.f32 %v448_v47, %v103_v48  ;;  %v435_v47 = vld [vmem:[%s665_s9] sm:$0xff] }
 0x116   :  { %v110_v51 = vpack.c.bf16 %v109_v50, %v108_v49  ;;  %v452_v49 = vld [vmem:[%s664_s8] ss:$0 sm:$0xff]  ;;  %s491_s8 = smov [#allocation4]  }
 0x117   :  { %s362_s1 = sshll.u32 %s491_s8, 4  ;;  %s363_s1 = int_to_ptr.vmem [resolvable:$true] %s362_s1 }
 0x118   :  { %384 = vmatmul.msk.bf16.vlgmr.msra.gmra.mxu0 %vm46_vm0, %v110_v51 }
 0x195   :  { %v143_v53 = vpop.f32.mrf.mxu0 }
 0x196   :  { %v144_v54 = vadd.f32 %v449_v52, %v143_v53 }
 0x198   :  { %v148_v55 = vadd.f32 %v144_v54, %v557_v0 }
 0x19a   :  { %150 = vst.msk [vmem:[#allocation2] sm:$0xff] %vm46_vm0, %v148_v55  ;;  %v152_v56 = vsel %vm46_vm0, %v148_v55, 0.0 }
 0x19b   :  { %153 = vadd.xlane.f32.xlu2 %v152_v56 }
 0x19d   :  { %v145_v57 = vpop.f32.mrf.mxu0 }
 0x19e   :  { %v146_v58 = vadd.f32 %v449_v52, %v145_v57 }
 0x1a0   :  { %v149_v59 = vadd.f32 %v146_v58, %v564_v2 }
 0x1a1   :  { %v261_v56 = vld [vmem:[#allocation2] sm:$0xff] }
 0x1a2   :  { %151 = vst.msk [vmem:[#allocation2 + $0x8] sm:$0xff] %vm46_vm0, %v149_v59  ;;  %v155_v60 = vsel %vm46_vm0, %v149_v59, 0.0 }
 0x1a3   :  { %156 = vadd.xlane.f32.xlu2 %v155_v60 }
 0x1a9   :  { %v262_v60 = vld [vmem:[#allocation2 + $0x8] sm:$0xff] }
 0x20e   :  { %v154_v61 = vpop.xlane.xlu2 %153 }
 0x20f   :  { %v158_v62 = vmul.f32 %v154_v61, %v568_v10 }
 0x211   :  { %v160_v63 = vsub.f32 %v148_v55, %v158_v62 }
 0x213   :  { %v162_v1 = vmul.f32 %v160_v63, %v160_v63 }
 0x215   :  { %v164_v0 = vsel %vm46_vm0, %v162_v1, 0.0 }
 0x216   :  { %165 = vadd.xlane.f32.xlu0 %v164_v0  ;;  %v157_v3 = vpop.xlane.xlu2 %156 }
 0x217   :  { %v159_v4 = vmul.f32 %v157_v3, %v568_v10 }
 0x219   :  { %v161_v5 = vsub.f32 %v149_v59, %v159_v4  ;;  %v453_v59 = vld [vmem:[%s666_s10] ss:$0 sm:$0xff]  ;;  %s492_s10 = smov 128  }
 0x21b   :  { %v163_v6 = vmul.f32 %v161_v5, %v161_v5 }
 0x21d   :  { %v167_v2 = vsel %vm46_vm0, %v163_v6, 0.0 }
 0x21e   :  { %168 = vadd.xlane.f32.xlu1 %v167_v2 }
 0x289   :  { %v166_v7 = vpop.xlane.xlu0 %165 }
 0x28a   :  { %v170_v8 = vmul.f32 %v166_v7, %v568_v10 }
 0x28c   :  { %v172_v9 = vadd.f32 1e-05, %v170_v8 }
 0x28e   :  { %460 = vrsqrt.f32 %v172_v9  ;;  %vm180_vm9 = vweird.f32 %v172_v9 }
 0x291   :  { %v169_v12 = vpop.xlane.xlu1 %168 }
 0x292   :  { %v171_v13 = vmul.f32 %v169_v12, %v568_v10  ;;  %v441_v10 = vld [vmem:[%s665_s9 + $0x30] sm:$0xff] }
 0x293   :  { %328 = vmatpush.bf16.msra.mxu2 %v441_v10 }
 0x294   :  { %v461_v15 = vpop.eup %460  ;;  %v173_v16 = vadd.f32 1e-05, %v171_v13 }
 0x295   :  { %v175_v17 = vmul.f32 %v461_v15, %v172_v9  ;;  %vm181_vm8 = vweird.f32 %v461_v15 }
 0x296   :  { %462 = vrsqrt.f32 %v173_v16  ;;  %vm182_vm10 = vmor %vm180_vm9, %vm181_vm8  ;;  %vm190_vm13 = vweird.f32 %v173_v16 }
 0x297   :  { %v176_v18 = vmul.f32 %v461_v15, %v175_v17  ;;  %329 = vmatpush.bf16.msra.mxu2 %v440_v28 }
 0x299   :  { %v177_v19 = vmul.f32 0.5, %v176_v18 }
 0x29b   :  { %v178_v21 = vsub.f32 1.5, %v177_v19  ;;  %330 = vmatpush.bf16.msra.mxu2 %v439_v34 }
 0x29c   :  { %v463_v22 = vpop.eup %462 }
 0x29d   :  { %v179_v23 = vmul.f32 %v461_v15, %v178_v21  ;;  %v185_v24 = vmul.f32 %v463_v22, %v173_v16  ;;  %vm191_vm11 = vweird.f32 %v463_v22 }
 0x29e   :  { %vm192_vm14 = vmor %vm190_vm13, %vm191_vm11 }
 0x29f   :  { %v183_v26 = vsel %vm182_vm10, %v461_v15, %v179_v23  ;;  %v186_v27 = vmul.f32 %v463_v22, %v185_v24  ;;  %331 = vmatpush.bf16.msra.mxu2 %v438_v44 }
 0x2a0   :  { %v194_v30 = vmul.f32 %v183_v26, %v160_v63 }
 0x2a1   :  { %v187_v31 = vmul.f32 0.5, %v186_v27 }
 0x2a2   :  { %v200_v32 = vmul.f32 %v450_v25, %v194_v30 }
 0x2a3   :  { %v188_v33 = vsub.f32 1.5, %v187_v31  ;;  %332 = vmatpush.bf16.msra.mxu2 %v437_v45 }
 0x2a4   :  { %v206_v35 = vadd.f32 %v451_v29, %v200_v32 }
 0x2a5   :  { %v189_v36 = vmul.f32 %v463_v22, %v188_v33 }
 0x2a6   :  { %v208_v37 = vpack.c.bf16 %v206_v35, %v206_v35 }
 0x2a7   :  { %v193_v38 = vsel %vm192_vm14, %v463_v22, %v189_v36  ;;  %333 = vmatpush.bf16.msra.mxu2 %v436_v46 }
 0x2a8   :  { %211 = vst.msk [vmem:[#allocation3] sm:$0xf] %vm210_vm12, %v208_v37  ;;  %v195_v39 = vmul.f32 %v193_v38, %v161_v5 }
 0x2aa   :  { %v201_v40 = vmul.f32 %v450_v25, %v195_v39 }
 0x2ab   :  { %334 = vmatpush.bf16.msra.mxu2 %v435_v47 }
 0x2ac   :  { %v207_v41 = vadd.f32 %v451_v29, %v201_v40 }
 0x2ae   :  { %v209_v42 = vpack.c.bf16 %v207_v41, %v207_v41 }
 0x2b0   :  { %212 = vst.msk [vmem:[#allocation3 + $0x4] sm:$0xf] %vm210_vm12, %v209_v42 }
 0x2b7   :  { %v432_v43 = vld [vmem:[#allocation3] sm:$0xff] }
 0x2b8   :  { %397 = vmatmul.msk.bf16.vlgmr.msra.gmra.mxu1 %vm46_vm0, %v432_v43 }
 0x335   :  { %v253_v48 = vpop.f32.mrf.mxu1 }
 0x336   :  { %v254_v50 = vadd.f32 %v452_v49, %v253_v48 }
 0x338   :  { %v258_v53 = vmax.f32 %v254_v50, 0.0 }
 0x33d   :  { %v255_v51 = vpop.f32.mrf.mxu1 }
 0x33e   :  { %v256_v52 = vadd.f32 %v452_v49, %v255_v51 }
 0x340   :  { %v259_v54 = vmax.f32 %v256_v52, 0.0 }
 0x342   :  { %v260_v55 = vpack.c.bf16 %v259_v54, %v258_v53 }
 0x344   :  { %335 = vmatmul.bf16.vlgmr.msra.gmra.mxu2 %v260_v55 }
 0x3c7   :  { %v336_v57 = vpop.f32.mrf.mxu2 }
 0x3c8   :  { %v341_v58 = vadd.f32 %v336_v57, %v261_v56 }
 0x3ca   :  { %343 = vst.msk [vmem:[#allocation2] sm:$0xff] %vm46_vm0, %v341_v58 }
 0x3cf   :  { %v338_v61 = vpop.f32.mrf.mxu2 }
 0x3d0   :  { %v342_v62 = vadd.f32 %v338_v61, %v262_v60 }
 0x3d1   :  { %v348_v63 = vld [vmem:[#allocation2] sm:$0xff] }
 0x3d2   :  { %344 = vst.msk [vmem:[#allocation2 + $0x8] sm:$0xff] %vm46_vm0, %v342_v62  ;;  %v354_v1 = vadd.f32 %v453_v59, %v348_v63 }
 0x3d4   :  { %356 = vst.msk [vmem:[#allocation4] sm:$0xff] %vm46_vm0, %v354_v1 }
 0x3d9   :  { %v349_v0 = vld [vmem:[#allocation2 + $0x8] sm:$0xff] }
 0x3da   :  { %v355_v3 = vadd.f32 %v453_v59, %v349_v0 }
 0x3dc   :  { %357 = vst.msk [vmem:[#allocation4 + $0x8] sm:$0xff] %vm46_vm0, %v355_v3 }
 0x3dd   :  { %370 = dma.vmem_to_hbm [thread:$0]  %s363_s1, 256, %s365_s29, [#allocation5], %s492_s10, %s492_s10, %s493_s30  }
 0x3de   :  { %488 = dma.done.wait [#allocation5], 256  }
 0x3df   :  { %489 = vsyncadd [#allocation5], 4294967040 }
 0x3e0   :  { %375 = vsyncpa [#allocation5], 1 }

</bundles_post_ra>
